<compile_context>
chip_gen: v6e
topology: v6e:2x2x1
jax: 0.10.0
libtpu: 0.0.40
codegen_flags: <defaults>
</compile_context>

<pallas_src>
import functools

import jax
import jax.numpy as jnp
from jax.experimental import pallas as pl
from jax.experimental.pallas import tpu as pltpu

LANE = 128
SUBLANE = 8
MAX_BLOCK_ROWS = 4096   # 4096 x 128 f32 = 2 MiB per input block
TARGET_GRID = 4         # keep >= 2 blocks per TensorCore on v7x


def _round_up(x, m):
    return ((x + m - 1) // m) * m


def _focal_kernel(pred_ref, true_ref, part_ref, *, gamma, alpha, rows,
                  block_rows, needs_row_mask):
    x = pred_ref[...].astype(jnp.float32)
    z = true_ref[...].astype(jnp.float32)

    # One exp(-|x|) feeds both the stable BCE log-term and the sigmoid.
    e = jnp.exp(-jnp.abs(x))

    # Numerically-stable BCE with logits (reduction='none'):
    #   bce = max(x, 0) - x*z + log(1 + exp(-|x|))
    bce = jnp.maximum(x, 0.0) - x * z + jnp.log1p(e)

    # sigmoid(x) = where(x >= 0, 1, e) / (1 + e); the divide becomes a single
    # approximate EUP reciprocal (its own bundle slot).
    inv = pl.reciprocal(1.0 + e, approx=True)
    p = jnp.where(x >= 0.0, 1.0, e) * inv

    # m = 1 - p_t computed directly (p_t never materialized).
    # Exact algebra, valid for soft targets z in [0, 1].
    m = p + z - 2.0 * (p * z)

    alpha_factor = (1.0 - alpha) + z * (2.0 * alpha - 1.0)

    if gamma == 1.5:
        mod = m * jnp.sqrt(m)          # m**1.5 without a generic pow
    elif gamma == 2.0:
        mod = m * m
    elif gamma == 1.0:
        mod = m
    elif gamma == 0.0:
        mod = None
    else:
        mod = m ** gamma               # generic fallback (exp+log on EUP)

    loss = bce * alpha_factor
    if mod is not None:
        loss = loss * mod

    def _partial(v):
        # (block_rows, 128) -> (1, 128): vreg-group adds on the VPU, then one
        # cross-sublane reduce on the (idle) XLU.
        s8 = jnp.sum(v.reshape(block_rows // SUBLANE, SUBLANE, LANE), axis=0)
        return jnp.sum(s8, axis=0, keepdims=True)

    if needs_row_mask:
        # Only the final block can contain out-of-range rows; every other grid
        # step runs the mask-free path.
        i = pl.program_id(0)
        last = pl.num_programs(0) - 1

        @pl.when(i != last)
        def _():
            part_ref[0] = _partial(loss)

        @pl.when(i == last)
        def _():
            row = jax.lax.broadcasted_iota(jnp.int32, (block_rows, LANE), 0)
            valid = (i * block_rows + row) < rows
            part_ref[0] = _partial(jnp.where(valid, loss, 0.0))
    else:
        part_ref[0] = _partial(loss)


def _focal_elementwise(x, z, gamma, alpha):
    """Plain-jnp per-element focal loss (used only for the tiny lane tail)."""
    x = x.astype(jnp.float32)
    z = z.astype(jnp.float32)
    bce = jnp.maximum(x, 0.0) - x * z + jnp.log1p(jnp.exp(-jnp.abs(x)))
    p = jax.nn.sigmoid(x)
    p_t = z * p + (1.0 - z) * (1.0 - p)
    alpha_factor = z * alpha + (1.0 - z) * (1.0 - alpha)
    return bce * alpha_factor * (1.0 - p_t) ** gamma


def focal_loss(pred, true, gamma=1.5, alpha=0.25, reduction='mean'):
    """Focal loss over BCEWithLogits, Pallas TPU kernel (mean/sum reduction)."""
    assert pred.shape == true.shape
    if reduction not in ('mean', 'sum'):
        # TODO(synk): reduction='none' (per-element output) is not implemented.
        raise NotImplementedError("only 'mean' and 'sum' reductions supported")

    total = pred.size
    gamma = float(gamma)
    alpha = float(alpha)

    flat_pred = pred.reshape(-1)
    flat_true = true.reshape(-1)

    # Sublane packing: 8 rows for 32-bit dtypes, 16 for bf16/fp16, 32 for int8.
    itemsize = jnp.dtype(pred.dtype).itemsize
    row_align = SUBLANE * max(1, 4 // max(1, itemsize))

    rows = total // LANE                   # full 128-wide rows for the kernel
    use_kernel = rows >= row_align
    bulk = rows * LANE if use_kernel else 0

    loss_sum = jnp.zeros((), jnp.float32)

    if use_kernel:
        # Keep the grid >= ~4 so the "parallel" axis feeds both v7x TCs, but
        # cap the block at 4096 rows (2 MiB f32 per input block; 8 MiB of
        # double buffers -- under the scoped-VMEM default on v5e/v6e/v7x).
        block_rows = min(MAX_BLOCK_ROWS,
                         _round_up(pl.cdiv(rows, TARGET_GRID), row_align))
        grid = pl.cdiv(rows, block_rows)
        needs_row_mask = (rows % block_rows) != 0

        # Free reshape when total is lane-aligned (no copy); otherwise a
        # prefix slice feeds the kernel and the remainder goes to the tail.
        pred2d = flat_pred[:bulk].reshape(rows, LANE)
        true2d = flat_true[:bulk].reshape(rows, LANE)

        kernel = functools.partial(
            _focal_kernel, gamma=gamma, alpha=alpha, rows=int(rows),
            block_rows=int(block_rows), needs_row_mask=bool(needs_row_mask))

        cost = pl.CostEstimate(
            flops=18 * bulk,
            transcendentals=4 * bulk,
            bytes_accessed=2 * bulk * itemsize + grid * LANE * 4,
        )

        partials = pl.pallas_call(
            kernel,
            out_shape=jax.ShapeDtypeStruct((grid, 1, LANE), jnp.float32),
            grid_spec=pltpu.PrefetchScalarGridSpec(
                num_scalar_prefetch=0,
                grid=(grid,),
                in_specs=[
                    pl.BlockSpec((block_rows, LANE), lambda i: (i, 0)),
                    pl.BlockSpec((block_rows, LANE), lambda i: (i, 0)),
                ],
                out_specs=pl.BlockSpec((1, 1, LANE), lambda i: (i, 0, 0)),
            ),
            compiler_params=pltpu.CompilerParams(
                dimension_semantics=("parallel",),
            ),
            cost_estimate=cost,
        )(pred2d, true2d)

        loss_sum = loss_sum + jnp.sum(partials)

    if bulk < total:
        # <128-element lane tail (or a too-tiny input): plain jnp, negligible.
        loss_sum = loss_sum + jnp.sum(
            _focal_elementwise(flat_pred[bulk:], flat_true[bulk:], gamma, alpha))

    if reduction == 'mean':
        return loss_sum / float(total)
    return loss_sum


def focal_loss_reference(pred, true, gamma=1.5, alpha=0.25):
    x = pred.astype(jnp.float32)
    z = true.astype(jnp.float32)
    bce = jnp.maximum(x, 0.0) - x * z + jnp.log1p(jnp.exp(-jnp.abs(x)))
    p = jax.nn.sigmoid(x)
    p_t = z * p + (1.0 - z) * (1.0 - p)
    alpha_factor = z * alpha + (1.0 - z) * (1.0 - alpha)
    loss = bce * alpha_factor * (1.0 - p_t) ** gamma
    return jnp.mean(loss)


if __name__ == "__main__":
    key = jax.random.PRNGKey(0)
    k_pred, k_true = jax.random.split(key)

    # PyTorch-style NCHW inputs: pred are raw logits, true are {0,1} targets.
    shape = (2, 4, 16, 16)  # N, C, H, W  -> 2048 elements (lane-aligned)
    pred = jax.random.normal(k_pred, shape, dtype=jnp.float32)
    true = (jax.random.uniform(k_true, shape) > 0.5).astype(jnp.float32)

    out = focal_loss(pred, true, gamma=1.5, alpha=0.25)
    out = jax.block_until_ready(out)
    ref = focal_loss_reference(pred, true, gamma=1.5, alpha=0.25)
    # Tolerance relaxed slightly for the approximate EUP reciprocal.
    assert jnp.allclose(out, ref, rtol=2e-3, atol=1e-5), (out, ref)

    # Lane-unaligned size: kernel handles the aligned bulk, jnp the tiny tail.
    k3, k4 = jax.random.split(k_pred)
    n = 16 * LANE + 50
    pred_u = jax.random.normal(k3, (n,), dtype=jnp.float32)
    true_u = (jax.random.uniform(k4, (n,)) > 0.5).astype(jnp.float32)
    out_u = jax.block_until_ready(focal_loss(pred_u, true_u))
    ref_u = focal_loss_reference(pred_u, true_u)
    assert jnp.allclose(out_u, ref_u, rtol=2e-3, atol=1e-5), (out_u, ref_u)

    print("KERNEL_OK")
</pallas_src>

<mosaic_0001>
module attributes {stable_mosaic.version = 11 : i64} {
  func.func @_focal_kernel(%arg0: i32, %arg1: memref<8x128xf32, #tpu.memory_space<vmem>>, %arg2: memref<8x128xf32, #tpu.memory_space<vmem>>, %arg3: memref<1x1x128xf32, #tpu.memory_space<vmem>>) attributes {dimension_semantics = [#tpu.dimension_semantics<parallel>], iteration_bounds = array<i64: 2>, scalar_prefetch = 0 : i64, scratch_operands = 0 : i64, tpu.core_type = #tpu.core_type<tc>, window_params = [{transform_indices = @transform_0, window_bounds = array<i64: 8, 128>}, {transform_indices = @transform_1, window_bounds = array<i64: 8, 128>}, {transform_indices = @transform_2, window_bounds = array<i64: 1, 1, 128>}]} {
    %c0 = arith.constant 0 : index
    %c0_0 = arith.constant 0 : index
    %0 = vector.load %arg1[%c0, %c0_0] : memref<8x128xf32, #tpu.memory_space<vmem>>, vector<8x128xf32>
    %c0_1 = arith.constant 0 : index
    %c0_2 = arith.constant 0 : index
    %1 = vector.load %arg2[%c0_1, %c0_2] : memref<8x128xf32, #tpu.memory_space<vmem>>, vector<8x128xf32>
    %2 = math.absf %0 : vector<8x128xf32>
    %cst = arith.constant 0.000000e+00 : f32
    %3 = vector.broadcast %cst : f32 to vector<8x128xf32>
    %4 = arith.subf %3, %2 : vector<8x128xf32>
    %5 = math.exp %4 : vector<8x128xf32>
    %cst_3 = arith.constant 0.000000e+00 : f32
    %6 = vector.broadcast %cst_3 : f32 to vector<8x128xf32>
    %7 = arith.maximumf %0, %6 : vector<8x128xf32>
    %8 = arith.mulf %0, %1 : vector<8x128xf32>
    %9 = arith.subf %7, %8 : vector<8x128xf32>
    %10 = math.log1p %5 : vector<8x128xf32>
    %11 = arith.addf %9, %10 : vector<8x128xf32>
    %cst_4 = arith.constant 1.000000e+00 : f32
    %12 = vector.broadcast %cst_4 : f32 to vector<8x128xf32>
    %13 = arith.addf %12, %5 : vector<8x128xf32>
    %14 = tpu.reciprocal %13 {approx = true} : vector<8x128xf32> -> vector<8x128xf32>
    %cst_5 = arith.constant 0.000000e+00 : f32
    %15 = vector.broadcast %cst_5 : f32 to vector<8x128xf32>
    %16 = arith.cmpf oge, %0, %15 : vector<8x128xf32>
    %cst_6 = arith.constant 1.000000e+00 : f32
    %17 = vector.broadcast %cst_6 : f32 to vector<8x128xf32>
    %18 = arith.select %16, %17, %5 : vector<8x128xi1>, vector<8x128xf32>
    %19 = arith.mulf %18, %14 : vector<8x128xf32>
    %20 = arith.addf %19, %1 : vector<8x128xf32>
    %21 = arith.mulf %19, %1 : vector<8x128xf32>
    %cst_7 = arith.constant 2.000000e+00 : f32
    %22 = vector.broadcast %cst_7 : f32 to vector<8x128xf32>
    %23 = arith.mulf %22, %21 : vector<8x128xf32>
    %24 = arith.subf %20, %23 : vector<8x128xf32>
    %cst_8 = arith.constant -5.000000e-01 : f32
    %25 = vector.broadcast %cst_8 : f32 to vector<8x128xf32>
    %26 = arith.mulf %1, %25 : vector<8x128xf32>
    %cst_9 = arith.constant 7.500000e-01 : f32
    %27 = vector.broadcast %cst_9 : f32 to vector<8x128xf32>
    %28 = arith.addf %27, %26 : vector<8x128xf32>
    %29 = math.sqrt %24 : vector<8x128xf32>
    %30 = arith.mulf %24, %29 : vector<8x128xf32>
    %31 = arith.mulf %11, %28 : vector<8x128xf32>
    %32 = arith.mulf %31, %30 : vector<8x128xf32>
    %33 = vector.shape_cast %32 : vector<8x128xf32> to vector<1x8x128xf32>
    %cst_10 = arith.constant dense<0.000000e+00> : vector<8x128xf32>
    %34 = vector.multi_reduction <add>, %33, %cst_10 [0] : vector<1x8x128xf32> to vector<8x128xf32>
    %cst_11 = arith.constant dense<0.000000e+00> : vector<128xf32>
    %35 = vector.multi_reduction <add>, %34, %cst_11 [0] : vector<8x128xf32> to vector<128xf32>
    %36 = vector.shape_cast %35 : vector<128xf32> to vector<1x128xf32>
    %c0_12 = arith.constant 0 : index
    %c0_13 = arith.constant 0 : index
    %c0_14 = arith.constant 0 : index
    %37 = vector.load %arg3[%c0_12, %c0_13, %c0_14] : memref<1x1x128xf32, #tpu.memory_space<vmem>>, vector<1x1x128xf32>
    %38 = vector.shape_cast %37 : vector<1x1x128xf32> to vector<1x128xf32>
    %39 = vector.shape_cast %36 : vector<1x128xf32> to vector<1x1x128xf32>
    tpu.vector_store %arg3[%c0_12, %c0_13, %c0_14], %39 {strides = array<i32>} : memref<1x1x128xf32, #tpu.memory_space<vmem>>, vector<1x1x128xf32>,
    return
  }
  func.func @transform_0(%arg0: i32) -> (i32, i32) {
    %c0_i32 = arith.constant 0 : i32
    %c0_i32_0 = arith.constant 0 : i32
    return %arg0, %c0_i32 : i32, i32
  }
  func.func @transform_1(%arg0: i32) -> (i32, i32) {
    %c0_i32 = arith.constant 0 : i32
    %c0_i32_0 = arith.constant 0 : i32
    return %arg0, %c0_i32 : i32, i32
  }
  func.func @transform_2(%arg0: i32) -> (i32, i32, i32) {
    %c0_i32 = arith.constant 0 : i32
    %c0_i32_0 = arith.constant 0 : i32
    %c0_i32_1 = arith.constant 0 : i32
    return %arg0, %c0_i32, %c0_i32_0 : i32, i32, i32
  }
}

</mosaic_0001>

<bundles_post_ra>
// kernel: tpu_custom_call.1
= control target key start
LH: loop header
LB: loop body
LE: loop exit
PB: predicated region body
PF: predicated region fallthrough
CT: control target
= control target key end

     0   :  { %7 = vsyncpa [#allocation3], 0  ;;  %s756_s0 = inlined_call_operand.hbm [shape: f32[16,128], index: 0, kind: input, shape index: {}]   ;;  %s757_s1 = inlined_call_operand.hbm [shape: f32[16,128], index: 1, kind: input, shape index: {}]   ;;  %s758_s2 = inlined_call_operand.hbm [shape: f32[2,1,128], index: 2, kind: output, shape index: {}]  }
   0x1   :  { %9 = vsyncpa [#allocation3 + $0x1], 0 }
   0x2   :  { %10 = vsyncpa [#allocation6], 0 }
   0x3   :  { %12 = vsyncpa [#allocation6 + $0x1], 0 }
   0x4   :  { %13 = vsyncpa [#allocation4], 0 }
   0x5   :  { %15 = vsyncpa [#allocation4 + $0x1], 0  ;;  %s561_s9 = smov 0   ;;  %s563_s10 = smov 0  }
   0x6   :  { %s565_s11 = smov 0   ;;  %s567_s12 = smov 0  }
   0x7 LB: > { %s582_s13 = sadd.s32 4294967295, %s541_s12   ;;  %s345_s14 = sadd.s32 4294967294, %s541_s12   ;;  %s541_s12 = sphi %s567_s12, %s777_s12   ;;  %s537_s11 = sphi %s565_s11, %s776_s11   ;;  %s533_s10 = sphi %s563_s10, %s775_s10   ;;  %s529_s9 = sphi %s561_s9, %s774_s9  }
   0x8   : > { %s586_s15 = sadd.s32 1, %s541_s12   ;;  %s28_s16 = sadd.s32 1, %s537_s11 }
   0x9   : > { %s25_s17 = ssub.s32 %s541_s12, %s586_s15  ;;  %p35_p0 = scmp.ne.s32.totalorder %s537_s11, %s533_s10 }
   0xa   : > { %p26_p1 = scmp.eq.s32.totalorder %s25_s17, 0  ;;  %p36_p2 = scmp.eq.s32.totalorder %s541_s12, 0 }
   0xb   : > { %p41_p3 = scmp.ne.s32.totalorder %s533_s10, %s529_s9  ;;  %p42_p4 = scmp.eq.s32.totalorder %s582_s13, 0 }
   0xc   : > { %s598_s18 = scalar_select %p26_p1, %s537_s11, %s28_s16  }
   0xd   : > { %p600_p5 = por %p36_p2, %p35_p0  ;;  %p604_p6 = por %p42_p4, %p41_p3 }
   0xe   : > { %p91_p7 = scmp.eq.s32.totalorder %s582_s13, 1  ;;  %p97_p8 = scmp.eq.s32.totalorder %s345_s14, 1 }
   0xf   : > { %s762_s20 = scalar_select %p604_p6, 1, 0 }
  0x10   : > { %p375_p10 = scmp.lt.s32.totalorder %s541_s12, 2  ;;  %p611_p11 = por %p91_p7, %p35_p0 }
  0x11   : > { %p615_p12 = por %p97_p8, %p41_p3  ;;  %s620_s23 = sand.u32 1, %s537_s11  }
  0x12   : > { %s763_s21 = scalar_select %p611_p11, 1, 0 }
  0x13   : > { %s764_s22 = scalar_select %p615_p12, 1, 0 }
  0x14   : > { %s349_s24 = sshll.u32 %s541_s12, 7  ;;  %s348_s25 = sshll.u32 %s620_s23, 3 }
  0x15   : > { %s629_s28 = scalar_lea.hbm %s756_s0, %s349_s24  ;;  %s121_s29 = scalar_lea.vmem [#allocation2], %s348_s25 }
  0x16   : > { %s128_s30 = sshll.u32 %s121_s29, 4  ;;  %p635_p13 = pnand %p375_p10, %p600_p5  ;;  %s639_s30 = int_to_ptr.vmem [resolvable:$true] %s128_s30 }
  0x17   : > { %s118_s4 = scalar_lea.sflag [#allocation3], %s620_s23  ;;  %s417_s5 = scalar_lea.hbm %s629_s28, 128 }
  0x18   : > { %p418_p2 = scmp.ne.s32.totalorder %s629_s28, %s417_s5  ;;  %p419_p3 = pneg %p635_p13 }
  0x19   : > { %s422_s8 = scalar_lea.hbm %s756_s0, 256  ;;  %p423_p5 = scmp.lt.s32.totalorder %s629_s28, %s756_s0 }
  0x1a   : > { %p420_p4 = pnand %p419_p3, %p418_p2  ;;  %p424_p8 = scmp.lt.s32.totalorder %s422_s8, %s417_s5 }
  0x1c   : > { %p421_p7 = pneg %p420_p4  ;;  %p425_p10 = por %p424_p8, %p423_p5 }
  0x1e   : > { %p426_p9 = pnand %p425_p10, %p421_p7 }
  0x20   : > { %429 = shalt.err (!%p426_p9)
}
  0x21   : > { %s430_s17 = scalar_lea.vmem %s639_s30, 128  ;;  %s543_s19 = smov [#allocation2]  }
  0x22   : > { %p431_p0 = scmp.ne.s32.totalorder %s639_s30, %s430_s17  ;;  %s435_s26 = sshll.u32 %s543_s19, 4  ;;  %s436_s26 = int_to_ptr.vmem [resolvable:$false] %s435_s26 }
  0x23   : > { %s437_s27 = scalar_lea.vmem %s436_s26, 256  ;;  %p438_p1 = scmp.lt.s32.totalorder %s639_s30, %s436_s26 }
  0x24   : > { %p433_p2 = pnand %p431_p0, %p419_p3  ;;  %p439_p12 = scmp.lt.s32.totalorder %s437_s27, %s430_s17 }
  0x26   : > { %p434_p4 = pneg %p433_p2  ;;  %p440_p11 = por %p439_p12, %p438_p1 }
  0x28   : > { %p441_p5 = pnand %p440_p11, %p434_p4 }
  0x2a   : > { %444 = shalt.err (!%p441_p5)
}
  0x2b   : > { %367 = dma.hbm_to_vmem [thread:$0]  (!%p635_p13), %s629_s28, 128, %s639_s30, %s118_s4  }
  0x2c   : > { %p766_p9 = scmp.lt.s32.totalorder %s541_s12, 3  ;;  %p767_p0 = scmp.ge.s32.totalorder %s541_s12, 1 }
  0x2d   : > { %s681_s7 = scalar_lea.hbm %s757_s1, %s349_s24  ;;  %s139_s8 = scalar_lea.vmem [#allocation5], %s348_s25 }
  0x2e   : > { %p672_p7 = pnand %p767_p0, %p766_p9  ;;  %s146_s14 = sshll.u32 %s139_s8, 4  ;;  %s147_s14 = int_to_ptr.vmem [resolvable:$true] %s146_s14 }
  0x2f   : > { %s136_s28 = scalar_lea.sflag [#allocation6], %s620_s23  ;;  %s445_s30 = scalar_lea.hbm %s681_s7, 128 }
  0x30   : > { %s768_s29 = scalar_select %p672_p7, 1, 0 }
  0x31   : > { %p446_p11 = scmp.ne.s32.totalorder %s681_s7, %s445_s30  ;;  %s450_s17 = scalar_lea.hbm %s757_s1, 256 }
  0x32   : > { %p451_p8 = scmp.lt.s32.totalorder %s681_s7, %s757_s1  ;;  %p452_p10 = scmp.lt.s32.totalorder %s450_s17, %s445_s30 }
  0x33   : > { %p448_p12 = pnand %p446_p11, %p419_p3 }
  0x34   : > { %p453_p2 = por %p452_p10, %p451_p8 }
  0x35   : > { %p449_p1 = pneg %p448_p12 }
  0x37   : > { %p454_p4 = pnand %p453_p2, %p449_p1 }
  0x39   : > { %457 = shalt.err (!%p454_p4)
}
  0x3a   : > { %s458_s25 = scalar_lea.vmem %s147_s14, 128  ;;  %s544_s23 = smov [#allocation5]  }
  0x3b   : > { %p459_p5 = scmp.ne.s32.totalorder %s147_s14, %s458_s25  ;;  %s463_s26 = sshll.u32 %s544_s23, 4  ;;  %s464_s26 = int_to_ptr.vmem [resolvable:$false] %s463_s26 }
  0x3c   : > { %s465_s27 = scalar_lea.vmem %s464_s26, 256  ;;  %p466_p11 = scmp.lt.s32.totalorder %s147_s14, %s464_s26 }
  0x3d   : > { %p461_p9 = pnand %p459_p5, %p419_p3  ;;  %p467_p12 = scmp.lt.s32.totalorder %s465_s27, %s458_s25 }
  0x3f   : > { %p462_p0 = pneg %p461_p9  ;;  %p468_p6 = por %p467_p12, %p466_p11 }
  0x41   : > { %p469_p7 = pnand %p468_p6, %p462_p0 }
  0x43   : > { %472 = shalt.err (!%p469_p7)
}
  0x44   : > { %370 = dma.hbm_to_vmem [thread:$0]  (!%p635_p13), %s681_s7, 128, %s147_s14, %s136_s28  }
  0x45   : > { %p769_p1 = scmp.ne.s32.totalorder %s768_s29, 0 }
  0x46   : > { %s707_s5 = sand.u32 (!%p769_p1), 1, %s533_s10   ;;  %p770_p3 = scmp.ne.s32.totalorder (!%p769_p1), %s762_s20, 0 }
  0x47   : > { %155 = sbr.rel (%p769_p1) target bundleno = 171 (0xab), region = 28  ;;  %s353_s6 = sshll.u32 (!%p769_p1), %s707_s5, 3 }
  0x48   : > { %s158_s8 = scalar_lea.sflag (!%p769_p1), [#allocation3], %s707_s5  ;;  %s161_s30 = scalar_lea.vmem (!%p769_p1), [#allocation2], %s353_s6 }
  0x4c   : > { %516 = dma.done.wait (%p770_p3), %s158_s8, 128  }
  0x4d   : > { %518 = vsyncadd (%p770_p3), %s158_s8, 4294967168  ;;  %s167_s3 = scalar_lea.sflag [#allocation6], %s707_s5  ;;  %s170_s7 = scalar_lea.vmem [#allocation5], %s353_s6 }
  0x4e   : > { %520 = dma.done.wait (%p770_p3), %s167_s3, 128  }
  0x4f   : > { %522 = vsyncadd (%p770_p3), %s167_s3, 4294967168  ;;  %v195_v0 = vld [vmem:[%s161_s30] sm:$0xff]  ;;  %v196_v8 = vld [vmem:[%s170_s7] sm:$0xff]  ;;  %s194_s20 = scalar_lea.vmem [#allocation7], %s707_s5  ;;  %s355_s14 = sshll.u32 %s582_s13, 4 }
  0x50   : > { %v197_v1 = vand.u32 2147483647, %v195_v0  ;;  %vm216_vm0 = vcmp.ge.f32.partialorder %v195_v0, 0.0  ;;  %v201_v18 = vmax.f32 %v195_v0, 0.0  ;;  %v202_v19 = vmul.f32 %v196_v8, %v195_v0  ;;  %s256_s29 = sshll.u32 %s194_s20, 4  ;;  %s254_s16 = scalar_lea.hbm %s758_s2, %s355_s14  ;;  %s257_s29 = int_to_ptr.vmem [resolvable:$true] %s256_s29 }
  0x51   : > { %v223_v23 = vmul.f32 -0.5, %v196_v8  ;;  %s244_s17 = scalar_lea.sflag [#allocation4], %s707_s5  ;;  %s473_s24 = scalar_lea.vmem %s257_s29, 16 }
  0x52   : > { %v198_v2 = vsub.f32 0.0, %v197_v1  ;;  %v203_v22 = vsub.f32 %v201_v18, %v202_v19  ;;  %p474_p6 = scmp.ne.s32.totalorder %s257_s29, %s473_s24  ;;  %p771_p13 = scmp.ne.s32.totalorder %s763_s21, 0 }
  0x53   : > { %v224_v26 = vadd.f32 0.75, %v223_v23  ;;  %s545_s19 = smov [#allocation7]  }
  0x54   : > { %v199_v3 = vmul.f32 1.442695, %v198_v2  ;;  %p475_p7 = pnand %p474_p6, %p771_p13  ;;  %s477_s25 = sshll.u32 %s545_s19, 4  ;;  %s478_s25 = int_to_ptr.vmem [resolvable:$false] %s477_s25 }
  0x55   : > { %s479_s23 = scalar_lea.vmem %s478_s25, 32  ;;  %p480_p10 = scmp.lt.s32.totalorder %s257_s29, %s478_s25 }
  0x56   : > { %409 = vpow2.f32 %v199_v3  ;;  %p476_p8 = pneg %p475_p7  ;;  %p481_p2 = scmp.lt.s32.totalorder %s479_s23, %s473_s24 }
  0x58   : > { %p482_p4 = por %p481_p2, %p480_p10 }
  0x5a   : > { %p483_p5 = pnand %p482_p4, %p476_p8 }
  0x63   : > { %v410_v4 = vpop.eup %409 }
  0x64   : > { %v204_v5 = vadd.f32 1.0, %v410_v4  ;;  %v217_v6 = vsel %vm216_vm0, 1.0, %v410_v4  ;;  %v207_v13 = vmul.f32 -0.5, %v410_v4  ;;  %v210_v17 = vand.u32 2147483647, %v410_v4 }
  0x66   : > { %411 = vrcp.f32 %v204_v5  ;;  %v208_v15 = vadd.f32 1.0, %v207_v13  ;;  %vm211_vm1 = vcmp.lt.f32.partialorder %v210_v17, 0.0004427343 }
  0x67   : > { %413 = vlog2.f32 %v204_v5 }
  0x68   : > { %v209_v21 = vmul.f32 %v410_v4, %v208_v15 }
  0x73   : > { %v412_v7 = vpop.eup %411 }
  0x74   : > { %v218_v9 = vmul.f32 %v412_v7, %v217_v6  ;;  %v414_v16 = vpop.eup %413 }
  0x75   : > { %v206_v20 = vmul.f32 0.6931472, %v414_v16 }
  0x76   : > { %v219_v10 = vadd.f32 %v218_v9, %v196_v8  ;;  %v220_v11 = vmul.f32 %v218_v9, %v196_v8 }
  0x77   : > { %v212_v24 = vsel %vm211_vm1, %v209_v21, %v206_v20 }
  0x78   : > { %v221_v12 = vmul.f32 2.0, %v220_v11  ;;  %v213_v25 = vadd.f32 %v212_v24, %v203_v22 }
  0x7a   : > { %v222_v14 = vsub.f32 %v219_v10, %v221_v12  ;;  %v233_v31 = vmul.f32 %v224_v26, %v213_v25 }
  0x7c   : > { %415 = vrsqrt.f32 %v222_v14  ;;  %vm227_vm2 = vcmp.eq.f32.partialorder %v222_v14, inf  ;;  %v230_v28 = vand.u32 2147483648, %v222_v14  ;;  %vm229_vm3 = vcmp.eq.f32.partialorder %v222_v14, 0.0 }
  0x89   : > { %v416_v27 = vpop.eup %415 }
  0x8a   : > { %v226_v29 = vmul.f32 %v416_v27, %v222_v14 }
  0x8c   : > { %v228_v30 = vsel %vm227_vm2, %v222_v14, %v226_v29 }
  0x8d   : > { %v231_v32 = vsel %vm229_vm3, %v230_v28, %v228_v30 }
  0x8e   : > { %v232_v33 = vmul.f32 %v231_v32, %v222_v14 }
  0x90   : > { %v234_v34 = vmul.f32 %v233_v31, %v232_v33 }
  0x92   : > { %v236_v35 = vrot.slane %v234_v34, 4 }
  0x94   : > { %v237_v36 = vadd.f32 %v236_v35, %v234_v34 }
  0x96   : > { %v238_v37 = vrot.slane %v237_v36, 2 }
  0x98   : > { %v239_v38 = vadd.f32 %v238_v37, %v237_v36 }
  0x9a   : > { %v240_v39 = vrot.slane %v239_v38, 1 }
  0x9c   : > { %v241_v40 = vadd.f32 %v240_v39, %v239_v38 }
  0x9e   : > { %242 = vst [vmem:[%s194_s20] sm:$0x1] %v241_v40 }
  0x9f   : > { %486 = shalt.err (!%p483_p5)
}
  0xa0   : > { %s487_s13 = scalar_lea.hbm %s254_s16, 16  ;;  %s491_s5 = scalar_lea.hbm %s758_s2, 32 }
  0xa1   : > { %p488_p9 = scmp.ne.s32.totalorder %s254_s16, %s487_s13  ;;  %p492_p12 = scmp.lt.s32.totalorder %s254_s16, %s758_s2 }
  0xa2   : > { %p493_p1 = scmp.lt.s32.totalorder %s491_s5, %s487_s13 }
  0xa3   : > { %p489_p0 = pnand %p488_p9, %p771_p13 }
  0xa4   : > { %p494_p3 = por %p493_p1, %p492_p12 }
  0xa5   : > { %p490_p11 = pneg %p489_p0 }
  0xa7   : > { %p495_p6 = pnand %p494_p3, %p490_p11 }
  0xa9   : > { %498 = shalt.err (!%p495_p6)
}
  0xaa   : > { %362 = dma.vmem_to_hbm [thread:$0]  (%p771_p13), %s257_s29, 16, %s254_s16, %s244_s17  }
  0xab PF: > { %s268_s30 = sand.u32 1, %s529_s9   ;;  %p772_p7 = scmp.ne.s32.totalorder %s764_s22, 0 }
  0xac   : > { %p773_p8 = scmp.ge.s32.totalorder %s541_s12, 2  ;;  %s269_s3 = scalar_lea.sflag [#allocation4], %s268_s30 }
  0xae   : > { %p372_p10 = pnand %p773_p8, %p772_p7 }
  0xb0   : > { %p373_p2 = pneg %p372_p10 }
  0xb2   : > { %524 = dma.done.wait (%p373_p2), %s269_s3, 16  }
  0xb3   : > { %526 = vsyncadd (%p373_p2), %s269_s3, 4294967280  ;;  %p18_p4 = scmp.ge.s32.totalorder %s586_s15, 4   ;;  %s774_s9 = smov %s533_s10 }
  0xb4   : > { %s775_s10 = smov %s537_s11  ;;  %s776_s11 = smov %s598_s18 }
  0xb5   : > { %s777_s12 = smov %s586_s15  ;;  %20 = sbr.rel (!%p18_p4) target bundleno = 7 (0x7), region = 86 }
  0xba   :  { %273 = vsyncpa [#allocation3], 1 }
  0xbb   :  { %275 = vsyncpa [#allocation3 + $0x1], 1 }
  0xbc   :  { %276 = vsyncpa [#allocation6], 1 }
  0xbd   :  { %278 = vsyncpa [#allocation6 + $0x1], 1 }
  0xbe   :  { %279 = vsyncpa [#allocation4], 1 }
  0xbf   :  { %281 = vsyncpa [#allocation4 + $0x1], 1 }

</bundles_post_ra>
